<compile_context>
chip_gen: v6e
topology: v6e:2x2x1
jax: 0.10.0
libtpu: 0.0.40
codegen_flags: <defaults>
</compile_context>

<pallas_src>
import math

import jax
import jax.numpy as jnp
from jax.experimental import pallas as pl
from jax.experimental.pallas import tpu as pltpu


def _mlp_kernel(x_ref, w1_ref, b1_ref, w2_ref, b2_ref, o_ref, acc_ref):
    # x_ref : (tm, H)        w1_ref: (H, tk)   b1_ref: (1, tk)
    # w2_ref: (tk, H)        b2_ref: (1, H)
    # o_ref : (tm, H)        acc_ref: (tm, H) f32 scratch
    k = pl.program_id(1)

    # Chunk of the first matmul: (tm, tk), f32 accumulation on the MXU.
    h = jnp.dot(x_ref[...], w1_ref[...], preferred_element_type=jnp.float32)
    h = h + b1_ref[...].astype(jnp.float32)

    # Exact (erf-based) GELU — matches PyTorch nn.GELU() default.
    inv_sqrt2 = jnp.float32(1.0 / math.sqrt(2.0))
    h = 0.5 * h * (1.0 + jax.lax.erf(h * inv_sqrt2))

    # This chunk's contribution to the second matmul (f32 accumulate).
    contrib = jnp.dot(h.astype(w2_ref.dtype), w2_ref[...],
                      preferred_element_type=jnp.float32)

    @pl.when(k == 0)
    def _init():
        # Fold b2 into the first chunk instead of a separate broadcast store
        # followed by a read-modify-write.
        acc_ref[...] = contrib + b2_ref[...].astype(jnp.float32)

    @pl.when(k > 0)
    def _accum():
        acc_ref[...] += contrib

    @pl.when(k == pl.num_programs(1) - 1)
    def _finalize():
        o_ref[...] = acc_ref[...].astype(o_ref.dtype)


def _pick_tile(total, preferred, align):
    """Largest `align`-aligned divisor of `total` that is <= preferred,
    falling back to the full dimension."""
    if total <= preferred:
        return total
    t = preferred - (preferred % align)
    while t >= align:
        if total % t == 0:
            return t
        t -= align
    return total


def _vmem_budget_bytes():
    """Per-generation VMEM budget: leave headroom on v7x (64 MiB physical),
    spend more on v5e/v6e (128 MiB physical)."""
    try:
        kind = jax.devices()[0].device_kind.lower()
    except Exception:  # pragma: no cover - defensive
        kind = ""
    if "v7" in kind or "7x" in kind:
        return 48 * 1024 * 1024
    if "v5" in kind or "v6" in kind:
        return 100 * 1024 * 1024
    return 64 * 1024 * 1024


def mlp_pallas(x, w1, b1, w2, b2, *, tile_m=512, tile_k=512,
               compute_dtype=jnp.bfloat16):
    """x: (..., H). w1: (H, 4H), b1: (4H,), w2: (4H, H), b2: (H,).

    compute_dtype: dtype the MXU operands (x, W1, W2) are streamed in.
    Defaults to bfloat16 (f32 accumulation is kept). Pass None / jnp.float32
    for strict parity with an f32 reference.
    """
    orig_shape = x.shape
    orig_dtype = x.dtype
    H = orig_shape[-1]
    H4 = w1.shape[1]
    x2d = x.reshape(-1, H)
    M = x2d.shape[0]

    # Cast streamed operands once in the wrapper (not per grid step).
    if compute_dtype is not None:
        x2d = x2d.astype(compute_dtype)
        w1 = w1.astype(compute_dtype)
        w2 = w2.astype(compute_dtype)
    cbytes = jnp.dtype(x2d.dtype).itemsize

    # Row tiling: one full-M block for small M; otherwise a 128-aligned tile
    # with M padded up to a multiple of it (padding sliced off at the end).
    if M <= tile_m:
        tm = M
        m_pad = M
    else:
        tm = tile_m
        m_pad = ((M + tm - 1) // tm) * tm
    if m_pad != M:
        x2d = jnp.pad(x2d, ((0, m_pad - M), (0, 0)))

    budget = _vmem_budget_bytes()

    # Weights-resident fast path: constant weight index maps -> W1/W2 DMA'd
    # from HBM exactly once for the whole kernel instead of once per row block.
    weight_bytes = (H * H4 + H4 * H) * cbytes
    inter_bytes = tm * H4 * 4  # f32 GELU intermediate for a full-4H chunk
    if weight_bytes <= budget // 3 and inter_bytes <= budget // 3:
        tk = H4
    else:
        tk = _pick_tile(H4, tile_k, 128)
    assert H4 % tk == 0, (H4, tk)

    b1_2d = b1.reshape(1, H4)
    b2_2d = b2.reshape(1, H)

    out2d = pl.pallas_call(
        _mlp_kernel,
        out_shape=jax.ShapeDtypeStruct((m_pad, H), orig_dtype),
        grid_spec=pltpu.PrefetchScalarGridSpec(
            num_scalar_prefetch=0,
            grid=(m_pad // tm, H4 // tk),
            in_specs=[
                pl.BlockSpec((tm, H), lambda i, k: (i, 0)),   # x tile (resident over k)
                pl.BlockSpec((H, tk), lambda i, k: (0, k)),   # W1 column chunk
                pl.BlockSpec((1, tk), lambda i, k: (0, k)),   # b1 chunk
                pl.BlockSpec((tk, H), lambda i, k: (k, 0)),   # W2 row chunk
                pl.BlockSpec((1, H), lambda i, k: (0, 0)),    # b2
            ],
            out_specs=pl.BlockSpec((tm, H), lambda i, k: (i, 0)),
            scratch_shapes=[pltpu.VMEM((tm, H), jnp.float32)],
        ),
        compiler_params=pltpu.CompilerParams(
            dimension_semantics=("parallel", "arbitrary"),
            vmem_limit_bytes=budget,
        ),
    )(x2d, w1, b1_2d, w2, b2_2d)

    if m_pad != M:
        out2d = out2d[:M]
    return out2d.reshape(orig_shape)


def init_params(key, hidden_dim, dtype=jnp.float32):
    """Deterministic init mimicking nn.Linear's kaiming-uniform / uniform bias."""
    k1, k2, k3, k4 = jax.random.split(key, 4)
    bound1 = 1.0 / math.sqrt(hidden_dim)
    bound2 = 1.0 / math.sqrt(4 * hidden_dim)
    # stored as (in, out) = transpose of PyTorch's (out, in)
    w1 = jax.random.uniform(k1, (hidden_dim, 4 * hidden_dim),
                            minval=-bound1, maxval=bound1, dtype=dtype)
    b1 = jax.random.uniform(k2, (4 * hidden_dim,),
                            minval=-bound1, maxval=bound1, dtype=dtype)
    w2 = jax.random.uniform(k3, (4 * hidden_dim, hidden_dim),
                            minval=-bound2, maxval=bound2, dtype=dtype)
    b2 = jax.random.uniform(k4, (hidden_dim,),
                            minval=-bound2, maxval=bound2, dtype=dtype)
    return w1, b1, w2, b2


if __name__ == "__main__":
    batch, seq, hidden = 2, 8, 32
    key = jax.random.PRNGKey(0)
    kx, kp = jax.random.split(key)

    x = jax.random.normal(kx, (batch, seq, hidden), dtype=jnp.float32)
    w1, b1, w2, b2 = init_params(kp, hidden)

    # pure-JAX reference (eval-mode dropout == identity)
    h_ref = x.reshape(-1, hidden) @ w1 + b1
    h_ref = 0.5 * h_ref * (1.0 + jax.lax.erf(h_ref / jnp.sqrt(2.0)))
    y_ref = (h_ref @ w2 + b2).reshape(batch, seq, hidden)

    # Default fast path: bf16-streamed operands, f32 accumulation.
    out_bf16 = mlp_pallas(x, w1, b1, w2, b2)
    jax.block_until_ready(out_bf16)
    assert jnp.allclose(out_bf16, y_ref, atol=3e-2, rtol=3e-2), \
        "bf16 path mismatch vs reference"

    # Strict f32 path for exact parity with the PyTorch reference.
    out_f32 = mlp_pallas(x, w1, b1, w2, b2, compute_dtype=None)
    jax.block_until_ready(out_f32)
    assert jnp.allclose(out_f32, y_ref, atol=1e-5, rtol=1e-5), \
        "f32 path mismatch vs reference"

    print("KERNEL_OK")
</pallas_src>

<mosaic_0001>
module attributes {stable_mosaic.version = 11 : i64} {
  func.func @_mlp_kernel(%arg0: i32, %arg1: i32, %arg2: memref<16x32xbf16, #tpu.memory_space<vmem>>, %arg3: memref<32x128xbf16, #tpu.memory_space<vmem>>, %arg4: memref<1x128xf32, #tpu.memory_space<vmem>>, %arg5: memref<128x32xbf16, #tpu.memory_space<vmem>>, %arg6: memref<1x32xf32, #tpu.memory_space<vmem>>, %arg7: memref<16x32xf32, #tpu.memory_space<vmem>>, %arg8: memref<16x32xf32, #tpu.memory_space<vmem>>) attributes {dimension_semantics = [#tpu.dimension_semantics<parallel>, #tpu.dimension_semantics<arbitrary>], iteration_bounds = array<i64: 1, 1>, scalar_prefetch = 0 : i64, scratch_operands = 1 : i64, tpu.core_type = #tpu.core_type<tc>, window_params = [{transform_indices = @transform_0, window_bounds = array<i64: 16, 32>}, {transform_indices = @transform_1, window_bounds = array<i64: 32, 128>}, {transform_indices = @transform_2, window_bounds = array<i64: 1, 128>}, {transform_indices = @transform_3, window_bounds = array<i64: 128, 32>}, {pipeline_mode = #tpu.pipeline_mode<synchronous>, transform_indices = @transform_4, window_bounds = array<i64: 1, 32>}, {transform_indices = @transform_5, window_bounds = array<i64: 16, 32>}]} {
    %c0 = arith.constant 0 : index
    %c0_0 = arith.constant 0 : index
    %0 = vector.load %arg2[%c0, %c0_0] : memref<16x32xbf16, #tpu.memory_space<vmem>>, vector<16x32xbf16>
    %c0_1 = arith.constant 0 : index
    %c0_2 = arith.constant 0 : index
    %1 = vector.load %arg3[%c0_1, %c0_2] : memref<32x128xbf16, #tpu.memory_space<vmem>>, vector<32x128xbf16>
    %cst = arith.constant dense<0.000000e+00> : vector<16x128xf32>
    %2 = tpu.matmul %0, %1, %cst {dimension_numbers = #tpu.dot_dimension_numbers<[1], [0], [0], [1], [0, 0, 1, 1], [], []>} : vector<16x32xbf16>, vector<32x128xbf16>, vector<16x128xf32> -> vector<16x128xf32>
    %c0_3 = arith.constant 0 : index
    %c0_4 = arith.constant 0 : index
    %3 = vector.load %arg4[%c0_3, %c0_4] : memref<1x128xf32, #tpu.memory_space<vmem>>, vector<1x128xf32>
    %4 = vector.broadcast %3 : vector<1x128xf32> to vector<16x128xf32>
    %5 = arith.addf %2, %4 : vector<16x128xf32>
    %cst_5 = arith.constant 5.000000e-01 : f32
    %6 = vector.broadcast %cst_5 : f32 to vector<16x128xf32>
    %7 = arith.mulf %6, %5 : vector<16x128xf32>
    %cst_6 = arith.constant 0.707106769 : f32
    %8 = vector.broadcast %cst_6 : f32 to vector<16x128xf32>
    %9 = arith.mulf %5, %8 : vector<16x128xf32>
    %10 = math.erf %9 : vector<16x128xf32>
    %cst_7 = arith.constant 1.000000e+00 : f32
    %11 = vector.broadcast %cst_7 : f32 to vector<16x128xf32>
    %12 = arith.addf %11, %10 : vector<16x128xf32>
    %13 = arith.mulf %7, %12 : vector<16x128xf32>
    %14 = arith.truncf %13 : vector<16x128xf32> to vector<16x128xbf16>
    %c0_8 = arith.constant 0 : index
    %c0_9 = arith.constant 0 : index
    %15 = vector.load %arg5[%c0_8, %c0_9] : memref<128x32xbf16, #tpu.memory_space<vmem>>, vector<128x32xbf16>
    %cst_10 = arith.constant dense<0.000000e+00> : vector<16x32xf32>
    %16 = tpu.matmul %14, %15, %cst_10 {dimension_numbers = #tpu.dot_dimension_numbers<[1], [0], [0], [1], [0, 0, 1, 1], [], []>} : vector<16x128xbf16>, vector<128x32xbf16>, vector<16x32xf32> -> vector<16x32xf32>
    %c0_i32 = arith.constant 0 : i32
    %17 = arith.cmpi eq, %arg1, %c0_i32 : i32
    %18 = arith.extui %17 : i1 to i32
    %c0_i32_11 = arith.constant 0 : i32
    %19 = arith.cmpi ne, %18, %c0_i32_11 : i32
    scf.if %19 {
      %c0_16 = arith.constant 0 : index
      %c0_17 = arith.constant 0 : index
      %26 = vector.load %arg6[%c0_16, %c0_17] : memref<1x32xf32, #tpu.memory_space<vmem>>, vector<1x32xf32>
      %27 = vector.broadcast %26 : vector<1x32xf32> to vector<16x32xf32>
      %28 = arith.addf %16, %27 : vector<16x32xf32>
      %c0_18 = arith.constant 0 : index
      %c0_19 = arith.constant 0 : index
      %29 = vector.load %arg8[%c0_18, %c0_19] : memref<16x32xf32, #tpu.memory_space<vmem>>, vector<16x32xf32>
      tpu.vector_store %arg8[%c0_18, %c0_19], %28 {strides = array<i32>} : memref<16x32xf32, #tpu.memory_space<vmem>>, vector<16x32xf32>,
    } else {
    }
    %c0_i32_12 = arith.constant 0 : i32
    %20 = arith.cmpi sgt, %arg1, %c0_i32_12 : i32
    %21 = arith.extui %20 : i1 to i32
    %c0_i32_13 = arith.constant 0 : i32
    %22 = arith.cmpi ne, %21, %c0_i32_13 : i32
    scf.if %22 {
      %c0_16 = arith.constant 0 : index
      %c0_17 = arith.constant 0 : index
      %26 = vector.load %arg8[%c0_16, %c0_17] : memref<16x32xf32, #tpu.memory_space<vmem>>, vector<16x32xf32>
      %27 = arith.addf %26, %16 : vector<16x32xf32>
      %c0_18 = arith.constant 0 : index
      %c0_19 = arith.constant 0 : index
      %28 = vector.load %arg8[%c0_18, %c0_19] : memref<16x32xf32, #tpu.memory_space<vmem>>, vector<16x32xf32>
      tpu.vector_store %arg8[%c0_18, %c0_19], %27 {strides = array<i32>} : memref<16x32xf32, #tpu.memory_space<vmem>>, vector<16x32xf32>,
    } else {
    }
    %c0_i32_14 = arith.constant 0 : i32
    %23 = arith.cmpi eq, %arg1, %c0_i32_14 : i32
    %24 = arith.extui %23 : i1 to i32
    %c0_i32_15 = arith.constant 0 : i32
    %25 = arith.cmpi ne, %24, %c0_i32_15 : i32
    scf.if %25 {
      %c0_16 = arith.constant 0 : index
      %c0_17 = arith.constant 0 : index
      %26 = vector.load %arg8[%c0_16, %c0_17] : memref<16x32xf32, #tpu.memory_space<vmem>>, vector<16x32xf32>
      %c0_18 = arith.constant 0 : index
      %c0_19 = arith.constant 0 : index
      %27 = vector.load %arg7[%c0_18, %c0_19] : memref<16x32xf32, #tpu.memory_space<vmem>>, vector<16x32xf32>
      tpu.vector_store %arg7[%c0_18, %c0_19], %26 {strides = array<i32>} : memref<16x32xf32, #tpu.memory_space<vmem>>, vector<16x32xf32>,
    } else {
    }
    return
  }
  func.func @transform_0(%arg0: i32, %arg1: i32) -> (i32, i32) {
    %c0_i32 = arith.constant 0 : i32
    %c0_i32_0 = arith.constant 0 : i32
    return %arg0, %c0_i32 : i32, i32
  }
  func.func @transform_1(%arg0: i32, %arg1: i32) -> (i32, i32) {
    %c0_i32 = arith.constant 0 : i32
    %c0_i32_0 = arith.constant 0 : i32
    return %c0_i32, %arg1 : i32, i32
  }
  func.func @transform_2(%arg0: i32, %arg1: i32) -> (i32, i32) {
    %c0_i32 = arith.constant 0 : i32
    %c0_i32_0 = arith.constant 0 : i32
    return %c0_i32, %arg1 : i32, i32
  }
  func.func @transform_3(%arg0: i32, %arg1: i32) -> (i32, i32) {
    %c0_i32 = arith.constant 0 : i32
    %c0_i32_0 = arith.constant 0 : i32
    return %arg1, %c0_i32 : i32, i32
  }
  func.func @transform_4(%arg0: i32, %arg1: i32) -> (i32, i32) {
    %c0_i32 = arith.constant 0 : i32
    %c0_i32_0 = arith.constant 0 : i32
    %c0_i32_1 = arith.constant 0 : i32
    return %c0_i32, %c0_i32_0 : i32, i32
  }
  func.func @transform_5(%arg0: i32, %arg1: i32) -> (i32, i32) {
    %c0_i32 = arith.constant 0 : i32
    %c0_i32_0 = arith.constant 0 : i32
    return %arg0, %c0_i32 : i32, i32
  }
}

</mosaic_0001>

<bundles_post_ra>
// kernel: tpu_custom_call.1
= control target key start
LH: loop header
LB: loop body
LE: loop exit
PB: predicated region body
PF: predicated region fallthrough
CT: control target
= control target key end

     0   :  { %v357_v1 = vmov 0.0   ;;  %vm358_vm0 = vmmov 0   ;;  %vm52_vm1 = vcmask 261120   ;;  %s439_s0 = inlined_call_operand.vmem [shape: bf16[16,32], index: 0, kind: input, shape index: {}]   ;;  %s440_s1 = inlined_call_operand.vmem [shape: bf16[32,128], index: 1, kind: input, shape index: {}]   ;;  %s441_s2 = inlined_call_operand.vmem [shape: f32[1,128], index: 2, kind: input, shape index: {}]   ;;  %s442_s3 = inlined_call_operand.vmem [shape: bf16[128,32], index: 3, kind: input, shape index: {}]   ;;  %s443_s4 = inlined_call_operand.vmem [shape: f32[1,32], index: 4, kind: input, shape index: {}]   ;;  %s444_s5 = inlined_call_operand.hbm [shape: f32[16,32], index: 5, kind: output, shape index: {}]  }
   0x1   :  { %v320_v0 = vld [vmem:[%s440_s1 + $0x8] sm:$0xff]   ;;  %287 = vmatprep.subr.bf16.mxu0 %v357_v1  ;;  %295 = vmatprep.subr.bf16.mxu1 %v357_v1  ;;  %v321_v2 = vld [vmem:[%s440_s1] sm:$0xff]   ;;  %v323_v3 = vld [vmem:[%s442_s3 + $0x38] sm:$0xff]  }
   0x2   :  { %288 = vmatpush3.bf16.msra.mxu0 %v320_v0  ;;  %291 = vmatprep.mubr.msk.bf16.mxu0 %vm358_vm0, %v357_v1  ;;  %v322_v4 = vld [vmem:[%s439_s0] sm:$0xff]  }
   0x3   :  { %289 = vmatprep.subr.bf16.mxu0 %v357_v1  ;;  %311 = vmatprep.mubr.msk.bf16.mxu1 %vm358_vm0, %v357_v1 }
   0x4   :  { %296 = vmatpush3.bf16.msra.mxu1 %v323_v3 }
   0x5   :  { %297 = vmatprep.subr.bf16.mxu1 %v357_v1 }
   0x6   :  { %290 = vmatpush3.bf16.msra.mxu0 %v321_v2 }
   0x9   :  { %292 = vmatmul.mubr.msk.bf16.vlgmr.msra.gmra.mxu0 %vm52_vm1, %v322_v4 }
   0xa   :  { %10 = vsyncpa [#allocation4], 0  ;;  %v324_v5 = vld [vmem:[%s442_s3 + $0x30] sm:$0xff]   ;;  %v325_v6 = vld [vmem:[%s442_s3 + $0x28] sm:$0xff]   ;;  %s359_s15 = smov [#allocation3]  }
   0xb   :  { %298 = vmatpush3.bf16.msra.mxu1 %v324_v5  ;;  %v326_v7 = vld [vmem:[%s442_s3 + $0x20] sm:$0xff]   ;;  %v327_v8 = vld [vmem:[%s442_s3 + $0x18] sm:$0xff]   ;;  %v328_v9 = vld [vmem:[%s442_s3 + $0x10] sm:$0xff]   ;;  %s250_s16 = sshll.u32 %s359_s15, 4  ;;  %s251_s16 = int_to_ptr.vmem [resolvable:$true] %s250_s16 }
   0xc   :  { %299 = vmatprep.subr.bf16.mxu1 %v357_v1  ;;  %v329_v10 = vld [vmem:[%s442_s3 + $0x8] sm:$0xff]   ;;  %v330_v11 = vld [vmem:[%s442_s3] sm:$0xff]   ;;  %p340_p1 = scmp.lt.s32.totalorder %s251_s16, %s251_s16 }
   0xd   :  { %v261_v12 = vld [vmem:[%s441_s2] ss:$0 sm:$0xff] }
   0xe   :  { %v274_v30 = vld [vmem:[%s443_s4] ss:$0 sm:$0xff]  ;;  %s335_s4 = scalar_lea.vmem %s251_s16, 256 }
   0xf   :  { %300 = vmatpush3.bf16.msra.mxu1 %v325_v6  ;;  %p336_p0 = scmp.ne.s32.totalorder %s251_s16, %s335_s4  ;;  %p341_p2 = scmp.lt.s32.totalorder %s335_s4, %s335_s4 }
  0x10   :  { %301 = vmatprep.subr.bf16.mxu1 %v357_v1 }
  0x11   :  { %p342_p3 = por %p341_p2, %p340_p1 }
  0x13   :  { %302 = vmatpush3.bf16.msra.mxu1 %v326_v7  ;;  %p343_p4 = pnand %p342_p3, %p336_p0 }
  0x14   :  { %303 = vmatprep.subr.bf16.mxu1 %v357_v1 }
  0x17   :  { %304 = vmatpush3.bf16.msra.mxu1 %v327_v8 }
  0x18   :  { %305 = vmatprep.subr.bf16.mxu1 %v357_v1 }
  0x1b   :  { %306 = vmatpush3.bf16.msra.mxu1 %v328_v9 }
  0x1c   :  { %307 = vmatprep.subr.bf16.mxu1 %v357_v1 }
  0x1f   :  { %308 = vmatpush3.bf16.msra.mxu1 %v329_v10 }
  0x20   :  { %309 = vmatprep.subr.bf16.mxu1 %v357_v1 }
  0x23   :  { %310 = vmatpush3.bf16.msra.mxu1 %v330_v11 }
  0xc9   :  { %v90_v13 = vpop.f32.mrf.mxu0 }
  0xca   :  { %v91_v14 = vadd.f32 %v261_v12, %v90_v13 }
  0xcb   :  { %v293_v15 = vpop.f32.mrf.mxu0 }
  0xcc   :  { %v99_v16 = vmul.f32 0.70710677, %v91_v14  ;;  %v97_v24 = vmul.f32 0.5, %v91_v14 }
  0xcd   :  { %v93_v17 = vpop.f32.mrf.mxu0 }
  0xce   :  { %331 = verf.f32 %v99_v16  ;;  %v94_v18 = vadd.f32 %v261_v12, %v93_v17 }
  0xcf   :  { %v294_v19 = vpop.f32.mrf.mxu0 }
  0xd0   :  { %v100_v20 = vmul.f32 0.70710677, %v94_v18  ;;  %v98_v25 = vmul.f32 0.5, %v94_v18 }
  0xd2   :  { %333 = verf.f32 %v100_v20 }
  0xdb   :  { %v332_v21 = vpop.eup %331 }
  0xdc   :  { %v103_v22 = vadd.f32 1.0, %v332_v21 }
  0xde   :  { %v105_v27 = vmul.f32 %v103_v22, %v97_v24 }
  0xdf   :  { %v334_v23 = vpop.eup %333 }
  0xe0   :  { %v104_v26 = vadd.f32 1.0, %v334_v23 }
  0xe2   :  { %v106_v28 = vmul.f32 %v104_v26, %v98_v25 }
  0xe4   :  { %v107_v29 = vpack.c.bf16 %v106_v28, %v105_v27 }
  0xe6   :  { %312 = vmatmul.mubr.bf16.vlgmr.msra.gmra.mxu1 %v107_v29 }
 0x1a6   :  { %v206_v31 = vpop.f32.mrf.mxu1 }
 0x1a7   :  { %v224_v32 = vadd.f32 %v274_v30, %v206_v31 }
 0x1a8   :  { %v313_v33 = vpop.f32.mrf.mxu1 }
 0x1a9   :  { %226 = vst.msk [vmem:[#allocation2] sm:$0xff] %vm52_vm1, %v224_v32 }
 0x1aa   :  { %v209_v34 = vpop.f32.mrf.mxu1 }
 0x1ab   :  { %v225_v35 = vadd.f32 %v274_v30, %v209_v34 }
 0x1ac   :  { %v314_v36 = vpop.f32.mrf.mxu1 }
 0x1ad   :  { %227 = vst.msk [vmem:[#allocation2 + $0x8] sm:$0xff] %vm52_vm1, %v225_v35 }
 0x1b0   :  { %v241_v37 = vld [vmem:[#allocation2] sm:$0xff] }
 0x1b1   :  { %243 = vst.msk [vmem:[#allocation3] sm:$0xff] %vm52_vm1, %v241_v37 }
 0x1b4   :  { %v242_v38 = vld [vmem:[#allocation2 + $0x8] sm:$0xff] }
 0x1b5   :  { %244 = vst.msk [vmem:[#allocation3 + $0x8] sm:$0xff] %vm52_vm1, %v242_v38 }
 0x1b6   :  { %346 = shalt.err (!%p343_p4)
}
 0x1b7   :  { %s360_s17 = smov 128   ;;  %s361_s18 = smov 8  }
 0x1b8   :  { %256 = dma.vmem_to_hbm [thread:$0]  %s251_s16, 256, %s444_s5, [#allocation4], %s360_s17, %s360_s17, %s361_s18  }
 0x1b9   :  { %355 = dma.done.wait [#allocation4], 256  }
 0x1ba   :  { %356 = vsyncadd [#allocation4], 4294967040 }
 0x1bb   :  { %260 = vsyncpa [#allocation4], 1 }

</bundles_post_ra>
